<compile_context>
chip_gen: v5e
topology: v5e:2x2
jax: 0.10.0
libtpu: 0.0.40
codegen_flags: <defaults>
</compile_context>

<pallas_src>
import functools

import jax
import jax.numpy as jnp
from jax.experimental import pallas as pl
from jax.experimental.pallas import tpu as pltpu


# ----------------------------------------------------------------------------
# Fused single-pass kernel: whole sample(s) resident in VMEM.
# ----------------------------------------------------------------------------
def _ca_fused_kernel(x_ref, w1t_ref, b1_ref, w2_ref, b2_ref, o_ref, *, inv_hw):
    # x_ref block: (Bt, C, HW). Do NOT materialize a full fp32 copy of the
    # block: the cast feeds straight into the reduction (read #1), and the
    # rescale re-reads the block in its native dtype (read #2).

    # ---- Global average pool: per-channel mean over spatial dims -------------
    pooled = (
        jnp.sum(x_ref[...].astype(jnp.float32), axis=-1, keepdims=True) * inv_hw
    )  # (Bt, C, 1)

    # ---- Squeeze/excite MLP on the pooled vector (tiny; VPU/XLU only) --------
    # conv1 (1x1): h[b, r] = relu(sum_c w1[r, c] * pooled[b, c] + b1[r])
    w1t = w1t_ref[...].astype(jnp.float32)                     # (C, Cr)
    h = jnp.sum(pooled * w1t, axis=1, keepdims=True)           # (Bt, 1, Cr)
    h = jnp.maximum(h + b1_ref[...].astype(jnp.float32), 0.0)  # ReLU

    # conv2 (1x1): s[b, c] = sigmoid(sum_r w2[c, r] * h[b, r] + b2[c])
    w2 = w2_ref[...].astype(jnp.float32)                       # (C, Cr)
    s = jnp.sum(w2 * h, axis=-1, keepdims=True)                # (Bt, C, 1)
    s = jax.nn.sigmoid(s + b2_ref[...].astype(jnp.float32))    # (Bt, C, 1)

    # ---- Channel-wise rescale (second read of the block) ---------------------
    # Cast only the tiny gate to the I/O dtype; bf16 blocks stay packed.
    o_ref[...] = (x_ref[...] * s.astype(o_ref.dtype)).astype(o_ref.dtype)


# ----------------------------------------------------------------------------
# Chunked fallback, pass 1: pool-accumulate over HW chunks, then MLP -> gate.
# ----------------------------------------------------------------------------
def _ca_pool_gate_kernel(x_ref, w1t_ref, b1_ref, w2_ref, b2_ref, gate_ref,
                         acc_ref, *, inv_hw, hw, hwc):
    k = pl.program_id(1)

    @pl.when(k == 0)
    def _init():
        acc_ref[...] = jnp.zeros_like(acc_ref)

    xs = x_ref[0].astype(jnp.float32)                           # (C, hwc)
    if hw % hwc != 0:
        # Ragged tail: zero out the out-of-bounds columns of the last chunk.
        col = jax.lax.broadcasted_iota(jnp.int32, xs.shape, 1)
        xs = jnp.where(col + k * hwc < hw, xs, 0.0)
    acc_ref[...] += jnp.sum(xs, axis=-1, keepdims=True)         # (C, 1)

    @pl.when(k == pl.num_programs(1) - 1)
    def _finalize():
        pooled = acc_ref[...] * inv_hw                           # (C, 1)
        w1t = w1t_ref[...].astype(jnp.float32)                   # (C, Cr)
        h = jnp.sum(w1t * pooled, axis=0, keepdims=True)         # (1, Cr)
        h = jnp.maximum(h + b1_ref[...].astype(jnp.float32), 0.0)
        w2 = w2_ref[...].astype(jnp.float32)                     # (C, Cr)
        s = jnp.sum(w2 * h, axis=-1, keepdims=True)              # (C, 1)
        s = jax.nn.sigmoid(s + b2_ref[...].astype(jnp.float32))
        gate_ref[0] = s.astype(gate_ref.dtype)


# ----------------------------------------------------------------------------
# Chunked fallback, pass 2: per-chunk channel-wise rescale.
# ----------------------------------------------------------------------------
def _ca_rescale_kernel(x_ref, gate_ref, o_ref):
    o_ref[0] = (x_ref[0] * gate_ref[0]).astype(o_ref.dtype)


# ----------------------------------------------------------------------------
# Wrapper helpers.
# ----------------------------------------------------------------------------
def _vmem_budget():
    """Usable VMEM: chip capacity minus headroom (generation-aware)."""
    try:
        cap = int(pltpu.get_tpu_info().vmem_capacity_bytes)
    except Exception:           # pragma: no cover - older jax / CPU tracing
        cap = 64 << 20          # conservative: v7x per-TensorCore VMEM
    return max(cap - (20 << 20), 16 << 20)


def _pick_block_batch(batch, per_sample_bytes, fixed_bytes, vmem_budget):
    """Pick Bt (samples per block): divides batch, fits VMEM, ~MiB-scale DMAs,
    and keeps the grid >= 2 steps when possible (v7x has 2 TensorCores)."""
    target_block_bytes = 4 << 20   # ~MiB-scale blocks reach ~85% of HBM roofline
    divisors = [d for d in range(1, batch + 1) if batch % d == 0]
    fitting = [d for d in divisors
               if 4 * d * per_sample_bytes + fixed_bytes + (2 << 20) <= vmem_budget]
    if not fitting:
        return None   # a single sample does not fit -> chunked fallback
    preferred = [d for d in fitting if batch // d >= 2] or fitting
    big_enough = [d for d in preferred if d * per_sample_bytes >= target_block_bytes]
    return big_enough[0] if big_enough else preferred[-1]
    # TODO(synk): allow Bt that does not divide B (ragged last block) to get
    # bigger blocks for prime batch sizes; padded samples only affect their
    # own (dropped) output rows so it is safe.


# ----------------------------------------------------------------------------
# Public entry point.
# ----------------------------------------------------------------------------
def ca_layer(x, w1, b1, w2, b2):
    """CALayer forward.

    x : (B, C, H, W)   NCHW input.
    w1: (Cr, C)        conv1 weight (PyTorch Conv2d(C, Cr, 1) weight, squeezed).
    b1: (Cr,)          conv1 bias.
    w2: (C, Cr)        conv2 weight (PyTorch Conv2d(Cr, C, 1) weight, squeezed).
    b2: (C,)           conv2 bias.
    Returns x * sigmoid(conv2(relu(conv1(avgpool(x))))), same shape/dtype as x.
    """
    B, C, H, W = x.shape
    cr = w1.shape[0]
    hw = H * W
    itemsize = jnp.dtype(x.dtype).itemsize
    inv_hw = 1.0 / float(hw)

    x3 = x.reshape(B, C, hw)
    w1t = jnp.transpose(w1)          # (C, Cr) -- host-side transpose, free
    b1r = b1.reshape(1, cr)          # (1, Cr)
    w2m = w2.reshape(C, cr)          # (C, Cr)
    b2c = b2.reshape(C, 1)           # (C, 1)

    budget = _vmem_budget()
    weight_bytes = sum(int(a.size) * jnp.dtype(a.dtype).itemsize
                       for a in (w1t, b1r, w2m, b2c))
    fixed_bytes = 2 * weight_bytes   # (double-buffered) weight blocks
    per_sample_bytes = C * hw * itemsize

    bt = _pick_block_batch(B, per_sample_bytes, fixed_bytes, budget)

    if bt is not None:
        # -------- Fused single-pass path: 1 HBM read + 1 HBM write of x ------
        need = 4 * bt * per_sample_bytes + fixed_bytes + (2 << 20)
        vmem_limit = int(min(max(need, 16 << 20), budget))   # never below need

        out = pl.pallas_call(
            functools.partial(_ca_fused_kernel, inv_hw=inv_hw),
            out_shape=jax.ShapeDtypeStruct((B, C, hw), x.dtype),
            grid_spec=pltpu.PrefetchScalarGridSpec(
                num_scalar_prefetch=0,
                grid=(B // bt,),
                in_specs=[
                    pl.BlockSpec((bt, C, hw), lambda b: (b, 0, 0)),
                    pl.BlockSpec((C, cr), lambda b: (0, 0)),
                    pl.BlockSpec((1, cr), lambda b: (0, 0)),
                    pl.BlockSpec((C, cr), lambda b: (0, 0)),
                    pl.BlockSpec((C, 1), lambda b: (0, 0)),
                ],
                out_specs=pl.BlockSpec((bt, C, hw), lambda b: (b, 0, 0)),
            ),
            compiler_params=pltpu.CompilerParams(
                dimension_semantics=("parallel",),
                vmem_limit_bytes=vmem_limit,
            ),
        )(x3, w1t, b1r, w2m, b2c)
        return out.reshape(B, C, H, W)

    # -------- Chunked two-call fallback (sample too big for VMEM) ------------
    # Pass 1: pool-accumulate over HW chunks + tiny MLP -> per-sample gate.
    # Pass 2: chunked rescale.  Costs one extra HBM read of x (~1.5x traffic),
    # but never exceeds the per-generation VMEM capacity.
    max_hwc = (budget - fixed_bytes - (4 << 20)) // (4 * C * itemsize)
    hwc = max(128, (int(max_hwc) // 128) * 128)
    hwc = min(hwc, ((hw + 127) // 128) * 128)
    n_chunks = -(-hw // hwc)

    gate = pl.pallas_call(
        functools.partial(_ca_pool_gate_kernel, inv_hw=inv_hw, hw=hw, hwc=hwc),
        out_shape=jax.ShapeDtypeStruct((B, C, 1), x.dtype),
        grid_spec=pltpu.PrefetchScalarGridSpec(
            num_scalar_prefetch=0,
            grid=(B, n_chunks),
            in_specs=[
                pl.BlockSpec((1, C, hwc), lambda b, k: (b, 0, k)),
                pl.BlockSpec((C, cr), lambda b, k: (0, 0)),
                pl.BlockSpec((1, cr), lambda b, k: (0, 0)),
                pl.BlockSpec((C, cr), lambda b, k: (0, 0)),
                pl.BlockSpec((C, 1), lambda b, k: (0, 0)),
            ],
            out_specs=pl.BlockSpec((1, C, 1), lambda b, k: (b, 0, 0)),
            scratch_shapes=[pltpu.VMEM((C, 1), jnp.float32)],
        ),
        compiler_params=pltpu.CompilerParams(
            dimension_semantics=("parallel", "arbitrary"),
            vmem_limit_bytes=int(min(
                max(2 * C * hwc * itemsize + fixed_bytes + (4 << 20), 16 << 20),
                budget)),
        ),
    )(x3, w1t, b1r, w2m, b2c)

    out = pl.pallas_call(
        _ca_rescale_kernel,
        out_shape=jax.ShapeDtypeStruct((B, C, hw), x.dtype),
        grid_spec=pltpu.PrefetchScalarGridSpec(
            num_scalar_prefetch=0,
            grid=(B, n_chunks),
            in_specs=[
                pl.BlockSpec((1, C, hwc), lambda b, k: (b, 0, k)),
                pl.BlockSpec((1, C, 1), lambda b, k: (b, 0, 0)),
            ],
            out_specs=pl.BlockSpec((1, C, hwc), lambda b, k: (b, 0, k)),
        ),
        compiler_params=pltpu.CompilerParams(
            dimension_semantics=("parallel", "parallel"),
            vmem_limit_bytes=int(min(
                max(4 * C * hwc * itemsize + (4 << 20), 16 << 20), budget)),
        ),
    )(x3, gate)
    return out.reshape(B, C, H, W)


def _reference(x, w1, b1, w2, b2):
    """Pure-JAX CALayer reference (mirrors the PyTorch module)."""
    xf = x.astype(jnp.float32)
    y = xf.mean(axis=(2, 3))                               # (B, C)  avg pool
    h = jnp.maximum(y @ w1.T + b1, 0.0)                    # (B, Cr) conv1+ReLU
    s = jax.nn.sigmoid(h @ w2.T + b2)                      # (B, C)  conv2+sigmoid
    return (xf * s[:, :, None, None]).astype(x.dtype)


if __name__ == "__main__":
    key = jax.random.PRNGKey(0)
    kx, kw1, kb1, kw2, kb2 = jax.random.split(key, 5)

    # channel must be >= 8 so that channel // 8 >= 1 (as the PyTorch module implies)
    B, C, H, W = 2, 32, 16, 16
    CR = C // 8

    x = jax.random.normal(kx, (B, C, H, W), dtype=jnp.float32)
    w1 = jax.random.normal(kw1, (CR, C), dtype=jnp.float32) * 0.1   # conv1 weight
    b1 = jax.random.normal(kb1, (CR,), dtype=jnp.float32) * 0.1     # conv1 bias
    w2 = jax.random.normal(kw2, (C, CR), dtype=jnp.float32) * 0.1   # conv2 weight
    b2 = jax.random.normal(kb2, (C,), dtype=jnp.float32) * 0.1      # conv2 bias

    out = jax.block_until_ready(ca_layer(x, w1, b1, w2, b2))

    ref = _reference(x, w1, b1, w2, b2)
    assert out.shape == (B, C, H, W)
    assert jnp.allclose(out, ref, atol=1e-5, rtol=1e-5)

    print("KERNEL_OK")
</pallas_src>

<mosaic_0001>
module attributes {stable_mosaic.version = 11 : i64} {
  func.func @_ca_fused_kernel(%arg0: i32, %arg1: memref<1x32x256xf32, #tpu.memory_space<vmem>>, %arg2: memref<32x4xf32, #tpu.memory_space<vmem>>, %arg3: memref<1x4xf32, #tpu.memory_space<vmem>>, %arg4: memref<32x4xf32, #tpu.memory_space<vmem>>, %arg5: memref<32x1xf32, #tpu.memory_space<vmem>>, %arg6: memref<1x32x256xf32, #tpu.memory_space<vmem>>) attributes {dimension_semantics = [#tpu.dimension_semantics<parallel>], iteration_bounds = array<i64: 2>, scalar_prefetch = 0 : i64, scratch_operands = 0 : i64, tpu.core_type = #tpu.core_type<tc>, window_params = [{transform_indices = @transform_0, window_bounds = array<i64: 1, 32, 256>}, {pipeline_mode = #tpu.pipeline_mode<synchronous>, transform_indices = @transform_1, window_bounds = array<i64: 32, 4>}, {pipeline_mode = #tpu.pipeline_mode<synchronous>, transform_indices = @transform_2, window_bounds = array<i64: 1, 4>}, {pipeline_mode = #tpu.pipeline_mode<synchronous>, transform_indices = @transform_3, window_bounds = array<i64: 32, 4>}, {pipeline_mode = #tpu.pipeline_mode<synchronous>, transform_indices = @transform_4, window_bounds = array<i64: 32, 1>}, {transform_indices = @transform_5, window_bounds = array<i64: 1, 32, 256>}]} {
    %c0 = arith.constant 0 : index
    %c0_0 = arith.constant 0 : index
    %c0_1 = arith.constant 0 : index
    %0 = vector.load %arg1[%c0, %c0_0, %c0_1] : memref<1x32x256xf32, #tpu.memory_space<vmem>>, vector<1x32x256xf32>
    %cst = arith.constant dense<0.000000e+00> : vector<1x32xf32>
    %1 = vector.multi_reduction <add>, %0, %cst [2] : vector<1x32x256xf32> to vector<1x32xf32>
    %2 = vector.shape_cast %1 : vector<1x32xf32> to vector<1x32x1xf32>
    %cst_2 = arith.constant 3.906250e-03 : f32
    %3 = vector.broadcast %cst_2 : f32 to vector<1x32x1xf32>
    %4 = arith.mulf %2, %3 : vector<1x32x1xf32>
    %c0_3 = arith.constant 0 : index
    %c0_4 = arith.constant 0 : index
    %5 = vector.load %arg2[%c0_3, %c0_4] : memref<32x4xf32, #tpu.memory_space<vmem>>, vector<32x4xf32>
    %6 = vector.shape_cast %5 : vector<32x4xf32> to vector<1x32x4xf32>
    %7 = vector.broadcast %4 : vector<1x32x1xf32> to vector<1x32x4xf32>
    %8 = arith.mulf %7, %6 : vector<1x32x4xf32>
    %cst_5 = arith.constant dense<0.000000e+00> : vector<1x4xf32>
    %9 = vector.multi_reduction <add>, %8, %cst_5 [1] : vector<1x32x4xf32> to vector<1x4xf32>
    %10 = vector.shape_cast %9 : vector<1x4xf32> to vector<1x1x4xf32>
    %c0_6 = arith.constant 0 : index
    %c0_7 = arith.constant 0 : index
    %11 = vector.load %arg3[%c0_6, %c0_7] : memref<1x4xf32, #tpu.memory_space<vmem>>, vector<1x4xf32>
    %12 = vector.shape_cast %11 : vector<1x4xf32> to vector<1x1x4xf32>
    %13 = arith.addf %10, %12 : vector<1x1x4xf32>
    %cst_8 = arith.constant 0.000000e+00 : f32
    %14 = vector.broadcast %cst_8 : f32 to vector<1x1x4xf32>
    %15 = arith.maximumf %13, %14 : vector<1x1x4xf32>
    %c0_9 = arith.constant 0 : index
    %c0_10 = arith.constant 0 : index
    %16 = vector.load %arg4[%c0_9, %c0_10] : memref<32x4xf32, #tpu.memory_space<vmem>>, vector<32x4xf32>
    %17 = vector.shape_cast %16 : vector<32x4xf32> to vector<1x32x4xf32>
    %18 = vector.broadcast %15 : vector<1x1x4xf32> to vector<1x32x4xf32>
    %19 = arith.mulf %17, %18 : vector<1x32x4xf32>
    %cst_11 = arith.constant dense<0.000000e+00> : vector<1x32xf32>
    %20 = vector.multi_reduction <add>, %19, %cst_11 [2] : vector<1x32x4xf32> to vector<1x32xf32>
    %21 = vector.shape_cast %20 : vector<1x32xf32> to vector<1x32x1xf32>
    %c0_12 = arith.constant 0 : index
    %c0_13 = arith.constant 0 : index
    %22 = vector.load %arg5[%c0_12, %c0_13] : memref<32x1xf32, #tpu.memory_space<vmem>>, vector<32x1xf32>
    %23 = vector.shape_cast %22 : vector<32x1xf32> to vector<1x32x1xf32>
    %24 = arith.addf %21, %23 : vector<1x32x1xf32>
    %25 = arith.negf %24 : vector<1x32x1xf32>
    %26 = math.exp %25 : vector<1x32x1xf32>
    %cst_14 = arith.constant 1.000000e+00 : f32
    %27 = vector.broadcast %cst_14 : f32 to vector<1x32x1xf32>
    %28 = arith.addf %27, %26 : vector<1x32x1xf32>
    %29 = arith.divf %27, %28 : vector<1x32x1xf32>
    %c0_15 = arith.constant 0 : index
    %c0_16 = arith.constant 0 : index
    %c0_17 = arith.constant 0 : index
    %30 = vector.load %arg1[%c0_15, %c0_16, %c0_17] : memref<1x32x256xf32, #tpu.memory_space<vmem>>, vector<1x32x256xf32>
    %31 = vector.broadcast %29 : vector<1x32x1xf32> to vector<1x32x256xf32>
    %32 = arith.mulf %30, %31 : vector<1x32x256xf32>
    %c0_18 = arith.constant 0 : index
    %c0_19 = arith.constant 0 : index
    %c0_20 = arith.constant 0 : index
    %33 = vector.load %arg6[%c0_18, %c0_19, %c0_20] : memref<1x32x256xf32, #tpu.memory_space<vmem>>, vector<1x32x256xf32>
    tpu.vector_store %arg6[%c0_18, %c0_19, %c0_20], %32 {strides = array<i32>} : memref<1x32x256xf32, #tpu.memory_space<vmem>>, vector<1x32x256xf32>,
    return
  }
  func.func @transform_0(%arg0: i32) -> (i32, i32, i32) {
    %c0_i32 = arith.constant 0 : i32
    %c0_i32_0 = arith.constant 0 : i32
    %c0_i32_1 = arith.constant 0 : i32
    return %arg0, %c0_i32, %c0_i32_0 : i32, i32, i32
  }
  func.func @transform_1(%arg0: i32) -> (i32, i32) {
    %c0_i32 = arith.constant 0 : i32
    %c0_i32_0 = arith.constant 0 : i32
    %c0_i32_1 = arith.constant 0 : i32
    return %c0_i32, %c0_i32_0 : i32, i32
  }
  func.func @transform_2(%arg0: i32) -> (i32, i32) {
    %c0_i32 = arith.constant 0 : i32
    %c0_i32_0 = arith.constant 0 : i32
    %c0_i32_1 = arith.constant 0 : i32
    return %c0_i32, %c0_i32_0 : i32, i32
  }
  func.func @transform_3(%arg0: i32) -> (i32, i32) {
    %c0_i32 = arith.constant 0 : i32
    %c0_i32_0 = arith.constant 0 : i32
    %c0_i32_1 = arith.constant 0 : i32
    return %c0_i32, %c0_i32_0 : i32, i32
  }
  func.func @transform_4(%arg0: i32) -> (i32, i32) {
    %c0_i32 = arith.constant 0 : i32
    %c0_i32_0 = arith.constant 0 : i32
    %c0_i32_1 = arith.constant 0 : i32
    return %c0_i32, %c0_i32_0 : i32, i32
  }
  func.func @transform_5(%arg0: i32) -> (i32, i32, i32) {
    %c0_i32 = arith.constant 0 : i32
    %c0_i32_0 = arith.constant 0 : i32
    %c0_i32_1 = arith.constant 0 : i32
    return %arg0, %c0_i32, %c0_i32_0 : i32, i32, i32
  }
}

</mosaic_0001>

<bundles_post_ra>
// kernel: tpu_custom_call.1
= control target key start
LH: loop header
LB: loop body
LE: loop exit
PB: predicated region body
PF: predicated region fallthrough
CT: control target
= control target key end

     0   :  { %10 = vsyncpa [#allocation3], 0  ;;  %s957_s0 = inlined_call_operand.hbm [shape: f32[2,32,256], index: 0, kind: input, shape index: {}]   ;;  %s958_s1 = inlined_call_operand.vmem [shape: f32[32,4], index: 1, kind: input, shape index: {}]   ;;  %s959_s2 = inlined_call_operand.vmem [shape: f32[1,4], index: 2, kind: input, shape index: {}]   ;;  %s960_s3 = inlined_call_operand.vmem [shape: f32[32,4], index: 3, kind: input, shape index: {}]   ;;  %s961_s4 = inlined_call_operand.vmem [shape: f32[32,1], index: 4, kind: input, shape index: {}]   ;;  %s962_s5 = inlined_call_operand.hbm [shape: f32[2,32,256], index: 5, kind: output, shape index: {}]  }
   0x1   :  { %12 = vsyncpa [#allocation3 + $0x1], 0 }
   0x2   :  { %13 = vsyncpa [#allocation4], 0 }
   0x3   :  { %15 = vsyncpa [#allocation4 + $0x1], 0  ;;  %s747_s18 = smov 0   ;;  %s749_s19 = smov 0  }
   0x4   :  { %s751_s20 = smov 0   ;;  %s753_s21 = smov 0  }
   0x5 LB: > { %s768_s22 = sadd.s32 4294967295, %s710_s21   ;;  %s524_s23 = sadd.s32 4294967294, %s710_s21   ;;  %s710_s21 = sphi %s753_s21, %s972_s21   ;;  %s706_s20 = sphi %s751_s20, %s971_s20   ;;  %s702_s19 = sphi %s749_s19, %s970_s19   ;;  %s698_s18 = sphi %s747_s18, %s969_s18  }
   0x6   : > { %s772_s24 = sadd.s32 1, %s710_s21   ;;  %s28_s25 = sadd.s32 1, %s706_s20 }
   0x7   : > { %s25_s26 = ssub.s32 %s710_s21, %s772_s24  ;;  %p35_p0 = scmp.ne.s32.totalorder %s706_s20, %s702_s19 }
   0x8   : > { %p26_p1 = scmp.eq.s32.totalorder %s25_s26, 0  ;;  %p36_p2 = scmp.eq.s32.totalorder %s710_s21, 0 }
   0x9   : > { %p41_p3 = scmp.ne.s32.totalorder %s702_s19, %s698_s18  ;;  %p42_p4 = scmp.eq.s32.totalorder %s768_s22, 0 }
   0xa   : > { %s784_s27 = scalar_select %p26_p1, %s706_s20, %s28_s25  }
   0xb   : > { %p786_p5 = por %p36_p2, %p35_p0  ;;  %p790_p6 = por %p42_p4, %p41_p3 }
   0xc   : > { %p149_p7 = scmp.eq.s32.totalorder %s768_s22, 1  ;;  %p155_p8 = scmp.eq.s32.totalorder %s524_s23, 1 }
   0xd   : > { %p556_p10 = scmp.lt.s32.totalorder %s710_s21, 2  ;;  %s187_s7 = sand.u32 1, %s706_s20  }
   0xe   : > { %p797_p11 = por %p149_p7, %p35_p0  ;;  %p801_p12 = por %p155_p8, %p41_p3 }
   0xf   : > { %s542_s8 = sshll.u32 %s710_s21, 6  ;;  %s527_s9 = sshll.u32 %s187_s7, 6 }
  0x10   : > { %s196_s12 = scalar_lea.hbm %s957_s0, %s542_s8  ;;  %s191_s14 = scalar_lea.vmem [#allocation2], %s527_s9 }
  0x11   : > { %s197_s13 = sshll.u32 %s196_s12, 4  ;;  %s199_s15 = sshll.u32 %s191_s14, 4  ;;  %s198_s13 = int_to_ptr.hbm [resolvable:$true] %s197_s13  ;;  %s200_s15 = int_to_ptr.vmem [resolvable:$true] %s199_s15 }
  0x12   : > { %p812_p13 = pnand %p556_p10, %p786_p5  ;;  %p530_p0 = scmp.ge.s32.totalorder %s710_s21, 1 }
  0x13   : > { %p207_p1 = scmp.lt.s32.totalorder %s710_s21, 3  ;;  %s188_s17 = scalar_lea.sflag [#allocation3], %s187_s7 }
  0x14   : > { %s614_s23 = sshra.s32 %s198_s13, 4  ;;  %p618_p3 = pneg %p812_p13  ;;  %s615_s23 = int_to_ptr.hbm [resolvable:$true] %s614_s23 }
  0x15   : > { %s616_s25 = scalar_lea.hbm %s615_s23, 64  ;;  %s621_s28 = scalar_lea.hbm %s957_s0, 128 }
  0x16   : > { %p617_p2 = scmp.ne.s32.totalorder %s615_s23, %s616_s25  ;;  %p622_p5 = scmp.lt.s32.totalorder %s615_s23, %s957_s0 }
  0x17   : > { %p623_p8 = scmp.lt.s32.totalorder %s621_s28, %s616_s25 }
  0x18   : > { %p619_p4 = pnand %p618_p3, %p617_p2 }
  0x19   : > { %p624_p10 = por %p623_p8, %p622_p5 }
  0x1a   : > { %p620_p7 = pneg %p619_p4 }
  0x1c   : > { %p625_p9 = pnand %p624_p10, %p620_p7 }
  0x1e   : > { %628 = shalt.err (!%p625_p9)
}
  0x1f   : > { %s712_s7 = smov 256   ;;  %s713_s11 = smov 16  }
  0x20   : > { %551 = dma.hbm_to_vmem [thread:$0]  (!%p812_p13), %s198_s13, 1024, %s200_s15, %s188_s17, %s712_s7, %s712_s7, %s713_s11  }
  0x21   : > { %p208_p2 = pnand %p530_p0, %p207_p1 }
  0x22   : > { %s833_s12 = sand.u32 (!%p208_p2), 1, %s702_s19  }
  0x23   : > { %211 = sbr.rel (%p208_p2) target bundleno = 480 (0x1e0), region = 40  ;;  %s531_s14 = sshll.u32 (!%p208_p2), %s833_s12, 6 }
  0x24   : > { %s214_s23 = scalar_lea.sflag (!%p208_p2), [#allocation3], %s833_s12  ;;  %s217_s25 = scalar_lea.vmem (!%p208_p2), [#allocation2], %s531_s14 }
  0x28   : > { %689 = dma.done.wait (%p790_p6), %s214_s23, 1024  }
  0x29   : > { %691 = vsyncadd (%p790_p6), %s214_s23, 4294966272  ;;  %v843_v0 = vld [vmem:[%s217_s25] sm:$0xff]  ;;  %v845_v1 = vld [vmem:[%s217_s25 + $0x8] sm:$0xff]  ;;  %vm277_vm0 = vcmask 31744   ;;  %v714_v57 = vmov 0   ;;  %s244_s23 = scalar_lea.vmem [#allocation5], %s531_s14 }
  0x2a   : > { %v847_v2 = vld [vmem:[%s217_s25 + $0x20] sm:$0xff]  ;;  %v253_v3 = vadd.f32 %v845_v1, %v843_v0  ;;  %v851_v4 = vld [vmem:[%s217_s25 + $0x28] sm:$0xff]  ;;  %v855_v6 = vld [vmem:[%s217_s25 + $0x10] sm:$0xff]  ;;  %597 = vset.pattern.permute.xlu1 %v714_v57  ;;  %595 = vset.pattern.permute.xlu2 %v714_v57  ;;  %s448_s15 = sshll.u32 %s244_s23, 4  ;;  %s436_s17 = scalar_lea.sflag [#allocation4], %s833_s12  ;;  %s449_s15 = int_to_ptr.vmem [resolvable:$true] %s448_s15 }
  0x2b   : > { %v259_v5 = vadd.f32 %v851_v4, %v847_v2  ;;  %v857_v7 = vld [vmem:[%s217_s25 + $0x18] sm:$0xff]  ;;  %v859_v8 = vld [vmem:[%s217_s25 + $0x30] sm:$0xff]  ;;  %v269_v15 = vld [vmem:[%s958_s1] sm:$0xff]  ;;  %596 = vset.pattern.permute.xlu0 %v714_v57  ;;  %s664_s9 = scalar_lea.hbm %s962_s5, 128 }
  0x2c   : > { %254 = vadd.xlane.f32.xlu0 %v253_v3  ;;  %v861_v9 = vld [vmem:[%s217_s25 + $0x38] sm:$0xff]  ;;  %v256_v10 = vadd.f32 %v857_v7, %v855_v6  ;;  %v271_v17 = vld [vmem:[%s958_s1 + $0x10] sm:$0xff]  ;;  %v270_v18 = vld [vmem:[%s958_s1 + $0x8] sm:$0xff]  ;;  %s543_s25 = sshll.u32 %s768_s22, 6 }
  0x2d   : > { %260 = vadd.xlane.f32.xlu1 %v259_v5  ;;  %v262_v11 = vadd.f32 %v861_v9, %v859_v8  ;;  %v272_v22 = vld [vmem:[%s958_s1 + $0x18] sm:$0xff]  ;;  %v291_v40 = vld [vmem:[%s959_s2] sm:$0x1]  ;;  %v296_v45 = vld [vmem:[%s960_s3 + $0x10] sm:$0xff]  ;;  %s447_s13 = scalar_lea.hbm %s962_s5, %s543_s25 }
  0x2e   : > { %v297_v44 = vld [vmem:[%s960_s3 + $0x18] sm:$0xff]  ;;  %v294_v46 = vld [vmem:[%s960_s3] sm:$0xff]  ;;  %v295_v54 = vld [vmem:[%s960_s3 + $0x8] sm:$0xff]  ;;  %s450_s16 = sshll.u32 %s447_s13, 4  ;;  %s451_s16 = int_to_ptr.hbm [resolvable:$true] %s450_s16 }
  0x2f   : > { %v318_v58 = vld [vmem:[%s961_s4 + $0x18] sm:$0xff]  ;;  %v317_v59 = vld [vmem:[%s961_s4 + $0x10] sm:$0xff]  ;;  %v315_v60 = vld [vmem:[%s961_s4] sm:$0xff]  ;;  %s658_s26 = sshra.s32 %s451_s16, 4  ;;  %s659_s26 = int_to_ptr.hbm [resolvable:$true] %s658_s26 }
  0x30   : > { %s660_s22 = scalar_lea.hbm %s659_s26, 64  ;;  %p665_p0 = scmp.lt.s32.totalorder %s659_s26, %s962_s5 }
  0x31   : > { %p661_p6 = scmp.ne.s32.totalorder %s659_s26, %s660_s22  ;;  %p666_p1 = scmp.lt.s32.totalorder %s664_s9, %s660_s22 }
  0x33   : > { %p662_p9 = pnand %p661_p6, %p797_p11  ;;  %p667_p3 = por %p666_p1, %p665_p0 }
  0x34   : > { %257 = vadd.xlane.f32.xlu0 %v256_v10 }
  0x35   : > { %263 = vadd.xlane.f32.xlu1 %v262_v11  ;;  %p663_p13 = pneg %p662_p9 }
  0x37   : > { %p668_p4 = pnand %p667_p3, %p663_p13 }
  0x9f   : > { %v255_v12 = vpop.xlane.xlu0 %254 }
  0xa0   : > { %v261_v13 = vpop.xlane.xlu1 %260  ;;  %v265_v14 = vmul.f32 0.00390625, %v255_v12 }
  0xa1   : > { %v267_v16 = vmul.f32 0.00390625, %v261_v13 }
  0xa2   : > { %v273_v20 = vmul.f32 %v269_v15, %v265_v14  ;;  %v316_v14 = vld [vmem:[%s961_s4 + $0x8] sm:$0xff] }
  0xa3   : > { %v275_v25 = vmul.f32 %v271_v17, %v267_v16 }
  0xa4   : > { %v278_v28 = vsel %vm277_vm0, %v273_v20, 0.0 }
  0xa5   : > { %v281_v31 = vsel %vm277_vm0, %v275_v25, 0.0 }
  0xa7   : > { %v258_v19 = vpop.xlane.xlu0 %257 }
  0xa8   : > { %v266_v21 = vmul.f32 0.00390625, %v258_v19  ;;  %v264_v23 = vpop.xlane.xlu1 %263 }
  0xa9   : > { %v268_v24 = vmul.f32 0.00390625, %v264_v23 }
  0xaa   : > { %v274_v26 = vmul.f32 %v270_v18, %v266_v21 }
  0xab   : > { %v276_v27 = vmul.f32 %v272_v22, %v268_v24 }
  0xac   : > { %v279_v29 = vsel %vm277_vm0, %v274_v26, 0.0 }
  0xad   : > { %v280_v30 = vadd.f32 %v279_v29, %v278_v28  ;;  %v283_v32 = vsel %vm277_vm0, %v276_v27, 0.0 }
  0xaf   : > { %v282_v33 = vadd.f32 %v281_v31, %v280_v30 }
  0xb1   : > { %v284_v34 = vadd.f32 %v283_v32, %v282_v33 }
  0xb3   : > { %v285_v35 = vrot.slane %v284_v34, 4 }
  0xb5   : > { %v286_v36 = vadd.f32 %v285_v35, %v284_v34 }
  0xb7   : > { %v287_v37 = vrot.slane %v286_v36, 2 }
  0xb9   : > { %v288_v38 = vadd.f32 %v287_v37, %v286_v36 }
  0xbb   : > { %v289_v39 = vrot.slane %v288_v38, 1 }
  0xbd   : > { %v290_v41 = vadd.f32 %v289_v39, %v288_v38 }
  0xbf   : > { %v292_v42 = vadd.f32 %v291_v40, %v290_v41 }
  0xc1   : > { %v293_v43 = vmax.f32 %v292_v42, 0.0 }
  0xc3   : > { %v298_v47 = vperm.slane %v293_v43, 0 }
  0xc5   : > { %v302_v48 = vmul.f32 %v298_v47, %v297_v44  ;;  %v301_v49 = vmul.f32 %v298_v47, %v296_v45  ;;  %v299_v50 = vmul.f32 %v298_v47, %v294_v46  ;;  %v300_v55 = vmul.f32 %v298_v47, %v295_v54 }
  0xc7   : > { %v312_v51 = vsel %vm277_vm0, %v302_v48, 0.0  ;;  %v309_v52 = vsel %vm277_vm0, %v301_v49, 0.0  ;;  %v303_v53 = vsel %vm277_vm0, %v299_v50, 0.0  ;;  %v306_v56 = vsel %vm277_vm0, %v300_v55, 0.0 }
  0xc8   : > { %313 = vadd.xlane.f32.xlu1 %v312_v51  ;;  %310 = vadd.xlane.f32.xlu0 %v309_v52 }
  0xc9   : > { %304 = vadd.xlane.f32.xlu2 %v303_v53 }
  0xd1   : > { %307 = vadd.xlane.f32.xlu2 %v306_v56 }
 0x13b   : > { %v314_v61 = vpop.xlane.xlu1 %313  ;;  %v311_v62 = vpop.xlane.xlu0 %310 }
 0x13c   : > { %v322_v63 = vadd.f32 %v318_v58, %v314_v61  ;;  %v321_v3 = vadd.f32 %v317_v59, %v311_v62  ;;  %v305_v5 = vpop.xlane.xlu2 %304 }
 0x13d   : > { %v319_v10 = vadd.f32 %v315_v60, %v305_v5 }
 0x13e   : > { %v536_v11 = vmul.f32 -1.442695, %v322_v63  ;;  %v535_v12 = vmul.f32 -1.442695, %v321_v3 }
 0x13f   : > { %v533_v13 = vmul.f32 -1.442695, %v319_v10 }
 0x140   : > { %598 = vpow2.f32 %v536_v11 }
 0x141   : > { %600 = vpow2.f32 %v535_v12 }
 0x142   : > { %602 = vpow2.f32 %v533_v13 }
 0x144   : > { %v308_v15 = vpop.xlane.xlu2 %307 }
 0x145   : > { %v320_v16 = vadd.f32 %v316_v14, %v308_v15 }
 0x146   : > { %v599_v17 = vpop.eup %598 }
 0x147   : > { %v601_v18 = vpop.eup %600  ;;  %v338_v19 = vadd.f32 1.0, %v599_v17  ;;  %v534_v22 = vmul.f32 -1.442695, %v320_v16 }
 0x148   : > { %v603_v20 = vpop.eup %602  ;;  %v337_v21 = vadd.f32 1.0, %v601_v18 }
 0x149   : > { %604 = vrcp.f32 %v338_v19  ;;  %v335_v23 = vadd.f32 1.0, %v603_v20  ;;  %v395_v53 = vand.u32 2147483648, %v338_v19  ;;  %vm389_vm10 = vweird.f32 %v338_v19 }
 0x14a   : > { %606 = vrcp.f32 %v337_v21  ;;  %v378_v33 = vand.u32 2147483647, %v337_v21  ;;  %v380_v34 = vand.u32 2147483648, %v337_v21  ;;  %vm374_vm3 = vweird.f32 %v337_v21 }
 0x14b   : > { %608 = vrcp.f32 %v335_v23  ;;  %v350_v38 = vand.u32 2147483648, %v335_v23  ;;  %v348_v40 = vand.u32 2147483647, %v335_v23  ;;  %vm344_vm5 = vweird.f32 %v335_v23 }
 0x14c   : > { %610 = vpow2.f32 %v534_v22  ;;  %v381_v42 = vor.u32 1.1754944e-38, %v380_v34  ;;  %vm379_vm6 = vcmp.eq.f32.partialorder %v378_v33, 8.507059e+37  ;;  %v393_v54 = vand.u32 2147483647, %v338_v19 }
 0x14d   : > { %v351_v46 = vor.u32 1.1754944e-38, %v350_v38  ;;  %vm349_vm8 = vcmp.eq.f32.partialorder %v348_v40, 8.507059e+37  ;;  %v396_v60 = vor.u32 1.1754944e-38, %v395_v53 }
 0x14e   : > { %vm394_vm13 = vcmp.eq.f32.partialorder %v393_v54, 8.507059e+37 }
 0x14f   : > { %v605_v24 = vpop.eup %604 }
 0x150   : > { %v607_v25 = vpop.eup %606  ;;  %v385_v26 = vmul.f32 %v605_v24, %v338_v19  ;;  %vm390_vm9 = vweird.f32 %v605_v24 }
 0x151   : > { %v609_v27 = vpop.eup %608  ;;  %v370_v28 = vmul.f32 %v607_v25, %v337_v21  ;;  %vm375_vm1 = vweird.f32 %v607_v25  ;;  %vm391_vm11 = vmor %vm389_vm10, %vm390_vm9 }
 0x152   : > { %v611_v29 = vpop.eup %610  ;;  %v340_v30 = vmul.f32 %v609_v27, %v335_v23  ;;  %v386_v36 = vsub.f32 1.0, %v385_v26  ;;  %vm345_vm2 = vweird.f32 %v609_v27  ;;  %vm376_vm4 = vmor %vm374_vm3, %vm375_vm1 }
 0x153   : > { %v336_v31 = vadd.f32 1.0, %v611_v29  ;;  %v371_v32 = vsub.f32 1.0, %v370_v28  ;;  %vm346_vm7 = vmor %vm344_vm5, %vm345_vm2 }
 0x154   : > { %v341_v35 = vsub.f32 1.0, %v340_v30  ;;  %v387_v44 = vmul.f32 %v605_v24, %v386_v36 }
 0x155   : > { %612 = vrcp.f32 %v336_v31  ;;  %v372_v37 = vmul.f32 %v607_v25, %v371_v32  ;;  %v365_v56 = vand.u32 2147483648, %v336_v31  ;;  %v363_v59 = vand.u32 2147483647, %v336_v31 }
 0x156   : > { %v342_v39 = vmul.f32 %v609_v27, %v341_v35  ;;  %v388_v51 = vadd.f32 %v605_v24, %v387_v44  ;;  %vm359_vm14 = vweird.f32 %v336_v31 }
 0x157   : > { %v373_v41 = vadd.f32 %v607_v25, %v372_v37  ;;  %v366_v63 = vor.u32 1.1754944e-38, %v365_v56  ;;  %vm364_vm0 = vcmp.eq.f32.partialorder %v363_v59, 8.507059e+37 }
 0x158   : > { %v343_v43 = vadd.f32 %v609_v27, %v342_v39  ;;  %v392_v57 = vsel %vm391_vm11, %v605_v24, %v388_v51 }
 0x159   : > { %v377_v45 = vsel %vm376_vm4, %v607_v25, %v373_v41  ;;  %v397_v62 = vsel %vm394_vm13, %v396_v60, %v392_v57 }
 0x15a   : > { %v382_v47 = vsel %vm379_vm6, %v381_v42, %v377_v45  ;;  %v347_v48 = vsel %vm346_vm7, %v609_v27, %v343_v43 }
 0x15b   : > { %v613_v49 = vpop.eup %612  ;;  %411 = vperm.xlu1 %597, %v382_v47   ;;  %v352_v50 = vsel %vm349_vm8, %v351_v46, %v347_v48 }
 0x15c   : > { %401 = vperm.xlu2 %595, %v352_v50   ;;  %v355_v52 = vmul.f32 %v613_v49, %v336_v31  ;;  %vm360_vm12 = vweird.f32 %v613_v49 }
 0x15d   : > { %vm361_vm15 = vmor %vm359_vm14, %vm360_vm12 }
 0x15e   : > { %v356_v55 = vsub.f32 1.0, %v355_v52 }
 0x160   : > { %v357_v58 = vmul.f32 %v613_v49, %v356_v55 }
 0x162   : > { %v358_v61 = vadd.f32 %v613_v49, %v357_v58 }
 0x164   : > { %416 = vperm.xlu2 %595, %v397_v62   ;;  %v362_v3 = vsel %vm361_vm15, %v613_v49, %v358_v61 }
 0x165   : > { %v367_v5 = vsel %vm364_vm0, %v366_v63, %v362_v3 }
 0x166   : > { %406 = vperm.xlu0 %596, %v367_v5  }
 0x1b6   : > { %v402_v10 = vpop.permute.xlu2 %401 }
 0x1b7   : > { %v419_v11 = vmul.f32 %v402_v10, %v843_v0  ;;  %v420_v12 = vmul.f32 %v402_v10, %v845_v1 }
 0x1b9   : > { %427 = vst [vmem:[%s244_s23] sm:$0xff] %v419_v11 }
 0x1ba   : > { %428 = vst [vmem:[%s244_s23 + $0x8] sm:$0xff] %v420_v12 }
 0x1be   : > { %v417_v13 = vpop.permute.xlu2 %416 }
 0x1bf   : > { %v425_v14 = vmul.f32 %v417_v13, %v859_v8  ;;  %v426_v15 = vmul.f32 %v417_v13, %v861_v9 }
 0x1c1   : > { %433 = vst [vmem:[%s244_s23 + $0x30] sm:$0xff] %v425_v14 }
 0x1c2   : > { %434 = vst [vmem:[%s244_s23 + $0x38] sm:$0xff] %v426_v15 }
 0x1cd   : > { %v412_v16 = vpop.permute.xlu1 %411 }
 0x1ce   : > { %v423_v17 = vmul.f32 %v412_v16, %v847_v2  ;;  %v424_v18 = vmul.f32 %v412_v16, %v851_v4 }
 0x1d0   : > { %431 = vst [vmem:[%s244_s23 + $0x20] sm:$0xff] %v423_v17 }
 0x1d1   : > { %432 = vst [vmem:[%s244_s23 + $0x28] sm:$0xff] %v424_v18 }
 0x1d8   : > { %v407_v0 = vpop.permute.xlu0 %406 }
 0x1d9   : > { %v421_v1 = vmul.f32 %v407_v0, %v855_v6  ;;  %v422_v8 = vmul.f32 %v407_v0, %v857_v7 }
 0x1db   : > { %429 = vst [vmem:[%s244_s23 + $0x10] sm:$0xff] %v421_v1 }
 0x1dc   : > { %430 = vst [vmem:[%s244_s23 + $0x18] sm:$0xff] %v422_v8 }
 0x1dd   : > { %671 = shalt.err (!%p668_p4)
}
 0x1de   : > { %s715_s12 = smov 256   ;;  %s716_s11 = smov 16  }
 0x1df   : > { %546 = dma.vmem_to_hbm [thread:$0]  (%p797_p11), %s449_s15, 1024, %s451_s16, %s436_s17, %s715_s12, %s715_s12, %s716_s11  }
 0x1e0 PF: > { %s465_s23 = sand.u32 1, %s698_s18   ;;  %p968_p7 = scmp.ge.s32.totalorder %s710_s21, 2 }
 0x1e1   : > { %s466_s25 = scalar_lea.sflag [#allocation4], %s465_s23 }
 0x1e2   : > { %p553_p5 = pnand %p968_p7, %p801_p12 }
 0x1e4   : > { %p554_p8 = pneg %p553_p5 }
 0x1e6   : > { %693 = dma.done.wait (%p554_p8), %s466_s25, 1024  }
 0x1e7   : > { %695 = vsyncadd (%p554_p8), %s466_s25, 4294966272  ;;  %p18_p10 = scmp.ge.s32.totalorder %s772_s24, 4   ;;  %s969_s18 = smov %s702_s19 }
 0x1e8   : > { %s970_s19 = smov %s706_s20  ;;  %s971_s20 = smov %s784_s27 }
 0x1e9   : > { %s972_s21 = smov %s772_s24  ;;  %20 = sbr.rel (!%p18_p10) target bundleno = 5 (0x5), region = 85 }
 0x1ee   :  { %472 = vsyncpa [#allocation3], 1 }
 0x1ef   :  { %474 = vsyncpa [#allocation3 + $0x1], 1 }
 0x1f0   :  { %475 = vsyncpa [#allocation4], 1 }
 0x1f1   :  { %477 = vsyncpa [#allocation4 + $0x1], 1 }

</bundles_post_ra>
